<compile_context>
chip_gen: v5e
topology: v5e:2x2
jax: 0.10.0
libtpu: 0.0.40
codegen_flags: <defaults>
</compile_context>

<pallas_src>
import math
import jax
import jax.numpy as jnp
import numpy as np
from jax.experimental import pallas as pl
from jax.experimental.pallas import tpu as pltpu


def _make_kernel(W, C, K, DIL, PAD, M, compute_dtype):
    """M = rows_per_step * W ; operates on flattened (M, C) slabs."""

    def kernel(h_ref, x_ref, wt_ref, bt_ref, wsr_ref, bsr_ref, wx_ref, out_ref):
        h = h_ref[...]                                            # (M, C) f32

        # time-position within each row, for zero-padding masks of the
        # "same" dilated conv (roll wraps across rows; mask kills those taps).
        pos = jax.lax.broadcasted_iota(jnp.int32, (M, C), 0) % W

        # fused gate|filter dilated conv: K shifted matmuls into one (M, 2C) acc
        gf = None
        for k in range(K):                                        # static unroll
            off = k * DIL - PAD                                   # taps h[w + off]
            if off == 0:
                hk = h
            else:
                rolled = pltpu.roll(h, shift=(-off) % M, axis=0)  # rolled[m]=h[m+off]
                valid = (pos + off >= 0) & (pos + off < W)
                hk = jnp.where(valid, rolled, 0.0)
            term = jnp.dot(hk.astype(compute_dtype), wt_ref[k],
                           preferred_element_type=jnp.float32)    # (M, 2C)
            gf = term if gf is None else gf + term
        gf = gf + bt_ref[...]

        a = jax.nn.sigmoid(gf[:, :C]) * jnp.tanh(gf[:, C:])       # (M, C)

        # fused skip|res 1x1 conv; residual add + 1/norm folded into wx/wsr/bsr.
        out = (jnp.dot(a.astype(compute_dtype), wsr_ref[...],
                       preferred_element_type=jnp.float32)
               + jnp.dot(x_ref[...].astype(compute_dtype), wx_ref[...],
                         preferred_element_type=jnp.float32)
               + bsr_ref[...])                                    # (M, S+C)
        out_ref[...] = out.astype(out_ref.dtype)                  # one lane-dense store

    return kernel


def _choose_row_block(rows, W, C, S, vmem_budget_bytes=8 * 1024 * 1024):
    """Pick rows-per-grid-step: as big as the VMEM budget allows, but keep
    >=2 grid steps (v7x has 2 TensorCores) and (R*W) % 8 == 0."""
    bytes_per_row = W * (2 * C + (S + C)) * 4 * 2   # in+out blocks, double-buffered
    r_cap = max(1, vmem_budget_bytes // max(1, bytes_per_row))
    if rows >= 2:
        r_cap = max(1, min(r_cap, rows // 2))
    best = None
    for r in range(1, rows + 1):
        if rows % r == 0 and r <= r_cap and (r * W) % 8 == 0:
            best = r
    if best is None:
        best = rows                                  # full-extent block is always legal
    return best


def eegwave_residual(x_nchw, diff_step, params, *, kernel_size=3, dilation=1,
                     norm_value=math.sqrt(2.0), compute_dtype=jnp.bfloat16,
                     row_block=None):
    B, C, H, W = x_nchw.shape
    K, DIL = kernel_size, dilation
    assert DIL * (K - 1) % 2 == 0, "need symmetric 'same' padding"
    PAD = DIL * (K - 1) // 2
    S = params["w_skip"].shape[1]
    inv_norm = 1.0 / float(norm_value)

    # TODO(synk): when stacking residual blocks, keep the whole model
    # channels-last and drop these entry/exit transposes (each is a full HBM
    # round-trip of the tensor).
    x_bhwc = jnp.transpose(x_nchw, (0, 2, 3, 1)).astype(jnp.float32)   # (B,H,W,C)

    # hoisted diffusion-step embedding: one tiny XLA matmul per batch
    emb = diff_step @ params["w_emb"] + params["b_emb"]                # (B, C)
    h_bhwc = x_bhwc + emb[:, None, None, :]

    rows = B * H
    x2d = x_bhwc.reshape(rows * W, C)
    h2d = h_bhwc.reshape(rows * W, C)

    # fused weights: (gate|filt) temporal conv, (skip|res*inv_norm) 1x1 conv,
    # and a constant [0 | inv_norm*I] passthrough that implements
    # res = (x + resid) / norm inside the same lane-dense output.
    wt = jnp.concatenate([params["wt_gate"], params["wt_filt"]], axis=2)        # (K,C,2C)
    bt = jnp.concatenate([params["bt_gate"], params["bt_filt"]], axis=1)        # (1,2C)
    w_sr = jnp.concatenate([params["w_skip"], params["w_res"] * inv_norm], 1)   # (C,S+C)
    b_sr = jnp.concatenate([params["b_skip"], params["b_res"] * inv_norm], 1)   # (1,S+C)
    w_x = jnp.concatenate([jnp.zeros((C, S), jnp.float32),
                           inv_norm * jnp.eye(C, dtype=jnp.float32)], axis=1)   # (C,S+C)

    wt_c = wt.astype(compute_dtype)
    w_sr_c = w_sr.astype(compute_dtype)
    w_x_c = w_x.astype(compute_dtype)
    bt_f = bt.astype(jnp.float32)
    b_sr_f = b_sr.astype(jnp.float32)

    R = row_block if row_block is not None else _choose_row_block(rows, W, C, S)
    assert rows % R == 0
    G = rows // R
    M = R * W

    kernel = _make_kernel(W, C, K, DIL, PAD, M, compute_dtype)

    def fixed(shape):
        return pl.BlockSpec(shape, lambda g: (0,) * len(shape))

    grid_spec = pltpu.PrefetchScalarGridSpec(
        num_scalar_prefetch=0,
        grid=(G,),
        in_specs=[
            pl.BlockSpec((M, C), lambda g: (g, 0)),      # h = x + step_emb
            pl.BlockSpec((M, C), lambda g: (g, 0)),      # x (residual input)
            fixed((K, C, 2 * C)),                        # fused temporal conv weights
            fixed((1, 2 * C)),                           # fused temporal conv bias
            fixed((C, S + C)),                           # fused skip|res weights
            fixed((1, S + C)),                           # fused skip|res bias
            fixed((C, S + C)),                           # residual passthrough matrix
        ],
        out_specs=pl.BlockSpec((M, S + C), lambda g: (g, 0)),
    )

    out2d = pl.pallas_call(
        kernel,
        out_shape=jax.ShapeDtypeStruct((rows * W, S + C), x_nchw.dtype),
        grid_spec=grid_spec,
        compiler_params=pltpu.CompilerParams(
            dimension_semantics=("parallel",)),
    )(h2d, x2d, wt_c, bt_f, w_sr_c, b_sr_f, w_x_c)

    out = out2d.reshape(B, H, W, S + C)
    skip = jnp.transpose(out[..., :S], (0, 3, 1, 2))     # (B, S, H, W)
    res = jnp.transpose(out[..., S:], (0, 3, 1, 2))      # (B, C, H, W)
    return skip, res


def reference(x_nchw, diff_step, params, *, kernel_size=3, dilation=1,
              norm_value=math.sqrt(2.0)):
    """Pure-JAX NCHW reference mirroring the PyTorch forward."""
    C = x_nchw.shape[1]
    S = params["w_skip"].shape[1]
    K, DIL = kernel_size, dilation
    PAD = DIL * (K - 1) // 2

    emb = diff_step @ params["w_emb"] + params["b_emb"]            # (B, C)
    h = x_nchw + emb[:, :, None, None]

    wt = jnp.concatenate([params["wt_gate"], params["wt_filt"]], axis=2)  # (K, C, 2C)
    wt_oihw = jnp.transpose(wt, (2, 1, 0))[:, :, None, :]                  # (2C, C, 1, K)
    bt = jnp.concatenate([params["bt_gate"], params["bt_filt"]], axis=1)[0]
    conv = jax.lax.conv_general_dilated(
        h, wt_oihw, window_strides=(1, 1),
        padding=((0, 0), (PAD, PAD)), rhs_dilation=(1, DIL),
        dimension_numbers=("NCHW", "OIHW", "NCHW")) + bt[None, :, None, None]
    gate, filt = conv[:, :C], conv[:, C:]
    a = jax.nn.sigmoid(gate) * jnp.tanh(filt)

    wsr = jnp.concatenate([params["w_skip"], params["w_res"]], axis=1)     # (C, S+C)
    wsr_oihw = wsr.T[:, :, None, None]                                     # (S+C, C, 1, 1)
    bsr = jnp.concatenate([params["b_skip"], params["b_res"]], axis=1)[0]
    out = jax.lax.conv_general_dilated(
        a, wsr_oihw, window_strides=(1, 1), padding=((0, 0), (0, 0)),
        dimension_numbers=("NCHW", "OIHW", "NCHW")) + bsr[None, :, None, None]
    skip, res_part = out[:, :S], out[:, S:]
    res = (x_nchw + res_part) * (1.0 / norm_value)
    return skip, res


if __name__ == "__main__":
    # small shapes: batch=2, res_channels=4, skip_channels=8,
    # eeg channels (H)=4, time (W)=16, step_embed_dim=32, kernel=3, dilation=2
    B, C, S, H, W, E = 2, 4, 8, 4, 16, 32
    K, DIL = 3, 2

    key = jax.random.PRNGKey(0)
    keys = jax.random.split(key, 8)
    x = jax.random.normal(keys[0], (B, C, H, W), jnp.float32)
    diff_step = jax.random.normal(keys[1], (B, E), jnp.float32)

    # deterministic parameter init (kaiming-style scales)
    w_emb = jax.random.normal(keys[2], (E, C), jnp.float32) / math.sqrt(E)
    b_emb = jax.random.normal(keys[3], (1, C), jnp.float32) * 0.1
    wt = jax.random.normal(keys[4], (K, C, 2 * C), jnp.float32) * math.sqrt(2.0 / (C * K))
    bt = jax.random.normal(keys[5], (1, 2 * C), jnp.float32) * 0.1
    wsr = jax.random.normal(keys[6], (C, S + C), jnp.float32) * math.sqrt(2.0 / C)
    bsr = jax.random.normal(keys[7], (1, S + C), jnp.float32) * 0.1

    params = dict(
        w_emb=w_emb, b_emb=b_emb,
        wt_gate=wt[:, :, :C], wt_filt=wt[:, :, C:],
        bt_gate=bt[:, :C], bt_filt=bt[:, C:],
        w_skip=wsr[:, :S], w_res=wsr[:, S:],
        b_skip=bsr[:, :S], b_res=bsr[:, S:],
    )

    skip_ref, res_ref = reference(x, diff_step, params, kernel_size=K, dilation=DIL)

    # 1) f32 matmul path: tight correctness check against the pure-JAX reference.
    skip_f32, res_f32 = eegwave_residual(x, diff_step, params, kernel_size=K,
                                         dilation=DIL, compute_dtype=jnp.float32)
    jax.block_until_ready((skip_f32, res_f32))
    np.testing.assert_allclose(np.asarray(skip_f32), np.asarray(skip_ref),
                               rtol=1e-4, atol=1e-4)
    np.testing.assert_allclose(np.asarray(res_f32), np.asarray(res_ref),
                               rtol=1e-4, atol=1e-4)

    # 2) bf16-input / f32-accumulate fast path (default): looser tolerance.
    skip_bf, res_bf = eegwave_residual(x, diff_step, params, kernel_size=K,
                                       dilation=DIL, compute_dtype=jnp.bfloat16)
    jax.block_until_ready((skip_bf, res_bf))
    np.testing.assert_allclose(np.asarray(skip_bf), np.asarray(skip_ref),
                               rtol=5e-2, atol=5e-2)
    np.testing.assert_allclose(np.asarray(res_bf), np.asarray(res_ref),
                               rtol=5e-2, atol=5e-2)

    print("KERNEL_OK")
</pallas_src>

<mosaic_0001>
module attributes {stable_mosaic.version = 11 : i64} {
  func.func @kernel(%arg0: i32, %arg1: memref<64x4xf32, #tpu.memory_space<vmem>>, %arg2: memref<64x4xf32, #tpu.memory_space<vmem>>, %arg3: memref<3x4x8xf32, #tpu.memory_space<vmem>>, %arg4: memref<1x8xf32, #tpu.memory_space<vmem>>, %arg5: memref<4x12xf32, #tpu.memory_space<vmem>>, %arg6: memref<1x12xf32, #tpu.memory_space<vmem>>, %arg7: memref<4x12xf32, #tpu.memory_space<vmem>>, %arg8: memref<64x12xf32, #tpu.memory_space<vmem>>) attributes {dimension_semantics = [#tpu.dimension_semantics<parallel>], iteration_bounds = array<i64: 2>, scalar_prefetch = 0 : i64, scratch_operands = 0 : i64, tpu.core_type = #tpu.core_type<tc>, window_params = [{transform_indices = @transform_0, window_bounds = array<i64: 64, 4>}, {transform_indices = @transform_1, window_bounds = array<i64: 64, 4>}, {pipeline_mode = #tpu.pipeline_mode<synchronous>, transform_indices = @transform_2, window_bounds = array<i64: 3, 4, 8>}, {pipeline_mode = #tpu.pipeline_mode<synchronous>, transform_indices = @transform_3, window_bounds = array<i64: 1, 8>}, {pipeline_mode = #tpu.pipeline_mode<synchronous>, transform_indices = @transform_4, window_bounds = array<i64: 4, 12>}, {pipeline_mode = #tpu.pipeline_mode<synchronous>, transform_indices = @transform_5, window_bounds = array<i64: 1, 12>}, {pipeline_mode = #tpu.pipeline_mode<synchronous>, transform_indices = @transform_6, window_bounds = array<i64: 4, 12>}, {transform_indices = @transform_7, window_bounds = array<i64: 64, 12>}]} {
    %c0 = arith.constant 0 : index
    %c0_0 = arith.constant 0 : index
    %0 = vector.load %arg1[%c0, %c0_0] : memref<64x4xf32, #tpu.memory_space<vmem>>, vector<64x4xf32>
    %1 = tpu.iota {dimensions = array<i32: 0>} : vector<64x4xi32>
    %c16_i32 = arith.constant 16 : i32
    %c0_i32 = arith.constant 0 : i32
    %2 = arith.cmpi eq, %c16_i32, %c0_i32 : i32
    %c1_i32 = arith.constant 1 : i32
    %3 = arith.select %2, %c1_i32, %c16_i32 : i32
    %4 = vector.broadcast %3 : i32 to vector<64x4xi32>
    %5 = arith.remsi %1, %4 : vector<64x4xi32>
    %c0_i32_1 = arith.constant 0 : i32
    %6 = vector.broadcast %c0_i32_1 : i32 to vector<64x4xi32>
    %7 = arith.cmpi ne, %5, %6 : vector<64x4xi32>
    %c0_i32_2 = arith.constant 0 : i32
    %8 = vector.broadcast %c0_i32_2 : i32 to vector<64x4xi32>
    %9 = arith.cmpi slt, %5, %8 : vector<64x4xi32>
    %c0_i32_3 = arith.constant 0 : i32
    %10 = arith.cmpi slt, %3, %c0_i32_3 : i32
    %11 = vector.broadcast %10 : i1 to vector<64x4xi1>
    %12 = vector.broadcast %11 : vector<64x4xi1> to vector<64x4xi1>
    %13 = arith.xori %9, %12 : vector<64x4xi1>
    %14 = arith.andi %13, %7 : vector<64x4xi1>
    %15 = vector.broadcast %3 : i32 to vector<64x4xi32>
    %16 = arith.addi %5, %15 : vector<64x4xi32>
    %17 = arith.select %14, %16, %5 : vector<64x4xi1>, vector<64x4xi32>
    %c2_i32 = arith.constant 2 : i32
    %18 = tpu.dynamic_rotate %0 by %c2_i32 dim 0 : vector<64x4xf32>, i32 -> vector<64x4xf32>
    %c-2_i32 = arith.constant -2 : i32
    %19 = vector.broadcast %c-2_i32 : i32 to vector<64x4xi32>
    %20 = arith.addi %17, %19 : vector<64x4xi32>
    %c0_i32_4 = arith.constant 0 : i32
    %21 = vector.broadcast %c0_i32_4 : i32 to vector<64x4xi32>
    %22 = arith.cmpi sge, %20, %21 : vector<64x4xi32>
    %c-2_i32_5 = arith.constant -2 : i32
    %23 = vector.broadcast %c-2_i32_5 : i32 to vector<64x4xi32>
    %24 = arith.addi %17, %23 : vector<64x4xi32>
    %c16_i32_6 = arith.constant 16 : i32
    %25 = vector.broadcast %c16_i32_6 : i32 to vector<64x4xi32>
    %26 = arith.cmpi slt, %24, %25 : vector<64x4xi32>
    %27 = arith.andi %22, %26 : vector<64x4xi1>
    %cst = arith.constant 0.000000e+00 : f32
    %28 = vector.broadcast %cst : f32 to vector<64x4xf32>
    %29 = arith.select %27, %18, %28 : vector<64x4xi1>, vector<64x4xf32>
    %c0_7 = arith.constant 0 : index
    %c0_8 = arith.constant 0 : index
    %c0_9 = arith.constant 0 : index
    %30 = vector.load %arg3[%c0_7, %c0_8, %c0_9] : memref<3x4x8xf32, #tpu.memory_space<vmem>>, vector<1x4x8xf32>
    %31 = vector.shape_cast %30 : vector<1x4x8xf32> to vector<4x8xf32>
    %cst_10 = arith.constant dense<0.000000e+00> : vector<64x8xf32>
    %32 = tpu.matmul %29, %31, %cst_10 {dimension_numbers = #tpu.dot_dimension_numbers<[1], [0], [0], [1], [0, 0, 1, 1], [], []>} : vector<64x4xf32>, vector<4x8xf32>, vector<64x8xf32> -> vector<64x8xf32>
    %c1 = arith.constant 1 : index
    %c0_11 = arith.constant 0 : index
    %c0_12 = arith.constant 0 : index
    %33 = vector.load %arg3[%c1, %c0_11, %c0_12] : memref<3x4x8xf32, #tpu.memory_space<vmem>>, vector<1x4x8xf32>
    %34 = vector.shape_cast %33 : vector<1x4x8xf32> to vector<4x8xf32>
    %cst_13 = arith.constant dense<0.000000e+00> : vector<64x8xf32>
    %35 = tpu.matmul %0, %34, %cst_13 {dimension_numbers = #tpu.dot_dimension_numbers<[1], [0], [0], [1], [0, 0, 1, 1], [], []>} : vector<64x4xf32>, vector<4x8xf32>, vector<64x8xf32> -> vector<64x8xf32>
    %36 = arith.addf %32, %35 : vector<64x8xf32>
    %c62_i32 = arith.constant 62 : i32
    %37 = tpu.dynamic_rotate %0 by %c62_i32 dim 0 : vector<64x4xf32>, i32 -> vector<64x4xf32>
    %c2_i32_14 = arith.constant 2 : i32
    %38 = vector.broadcast %c2_i32_14 : i32 to vector<64x4xi32>
    %39 = arith.addi %17, %38 : vector<64x4xi32>
    %c0_i32_15 = arith.constant 0 : i32
    %40 = vector.broadcast %c0_i32_15 : i32 to vector<64x4xi32>
    %41 = arith.cmpi sge, %39, %40 : vector<64x4xi32>
    %c2_i32_16 = arith.constant 2 : i32
    %42 = vector.broadcast %c2_i32_16 : i32 to vector<64x4xi32>
    %43 = arith.addi %17, %42 : vector<64x4xi32>
    %c16_i32_17 = arith.constant 16 : i32
    %44 = vector.broadcast %c16_i32_17 : i32 to vector<64x4xi32>
    %45 = arith.cmpi slt, %43, %44 : vector<64x4xi32>
    %46 = arith.andi %41, %45 : vector<64x4xi1>
    %cst_18 = arith.constant 0.000000e+00 : f32
    %47 = vector.broadcast %cst_18 : f32 to vector<64x4xf32>
    %48 = arith.select %46, %37, %47 : vector<64x4xi1>, vector<64x4xf32>
    %c2 = arith.constant 2 : index
    %c0_19 = arith.constant 0 : index
    %c0_20 = arith.constant 0 : index
    %49 = vector.load %arg3[%c2, %c0_19, %c0_20] : memref<3x4x8xf32, #tpu.memory_space<vmem>>, vector<1x4x8xf32>
    %50 = vector.shape_cast %49 : vector<1x4x8xf32> to vector<4x8xf32>
    %cst_21 = arith.constant dense<0.000000e+00> : vector<64x8xf32>
    %51 = tpu.matmul %48, %50, %cst_21 {dimension_numbers = #tpu.dot_dimension_numbers<[1], [0], [0], [1], [0, 0, 1, 1], [], []>} : vector<64x4xf32>, vector<4x8xf32>, vector<64x8xf32> -> vector<64x8xf32>
    %52 = arith.addf %36, %51 : vector<64x8xf32>
    %c0_22 = arith.constant 0 : index
    %c0_23 = arith.constant 0 : index
    %53 = vector.load %arg4[%c0_22, %c0_23] : memref<1x8xf32, #tpu.memory_space<vmem>>, vector<1x8xf32>
    %54 = vector.broadcast %53 : vector<1x8xf32> to vector<64x8xf32>
    %55 = arith.addf %52, %54 : vector<64x8xf32>
    %56 = vector.extract_strided_slice %55 {offsets = [0, 0], sizes = [64, 4], strides = [1, 1]} : vector<64x8xf32> to vector<64x4xf32>
    %57 = arith.negf %56 : vector<64x4xf32>
    %58 = math.exp %57 : vector<64x4xf32>
    %cst_24 = arith.constant 1.000000e+00 : f32
    %59 = vector.broadcast %cst_24 : f32 to vector<64x4xf32>
    %60 = arith.addf %59, %58 : vector<64x4xf32>
    %61 = arith.divf %59, %60 : vector<64x4xf32>
    %62 = vector.extract_strided_slice %55 {offsets = [0, 4], sizes = [64, 4], strides = [1, 1]} : vector<64x8xf32> to vector<64x4xf32>
    %63 = math.tanh %62 : vector<64x4xf32>
    %64 = arith.mulf %61, %63 : vector<64x4xf32>
    %c0_25 = arith.constant 0 : index
    %c0_26 = arith.constant 0 : index
    %65 = vector.load %arg5[%c0_25, %c0_26] : memref<4x12xf32, #tpu.memory_space<vmem>>, vector<4x12xf32>
    %cst_27 = arith.constant dense<0.000000e+00> : vector<64x12xf32>
    %66 = tpu.matmul %64, %65, %cst_27 {dimension_numbers = #tpu.dot_dimension_numbers<[1], [0], [0], [1], [0, 0, 1, 1], [], []>} : vector<64x4xf32>, vector<4x12xf32>, vector<64x12xf32> -> vector<64x12xf32>
    %c0_28 = arith.constant 0 : index
    %c0_29 = arith.constant 0 : index
    %67 = vector.load %arg2[%c0_28, %c0_29] : memref<64x4xf32, #tpu.memory_space<vmem>>, vector<64x4xf32>
    %c0_30 = arith.constant 0 : index
    %c0_31 = arith.constant 0 : index
    %68 = vector.load %arg7[%c0_30, %c0_31] : memref<4x12xf32, #tpu.memory_space<vmem>>, vector<4x12xf32>
    %cst_32 = arith.constant dense<0.000000e+00> : vector<64x12xf32>
    %69 = tpu.matmul %67, %68, %cst_32 {dimension_numbers = #tpu.dot_dimension_numbers<[1], [0], [0], [1], [0, 0, 1, 1], [], []>} : vector<64x4xf32>, vector<4x12xf32>, vector<64x12xf32> -> vector<64x12xf32>
    %70 = arith.addf %66, %69 : vector<64x12xf32>
    %c0_33 = arith.constant 0 : index
    %c0_34 = arith.constant 0 : index
    %71 = vector.load %arg6[%c0_33, %c0_34] : memref<1x12xf32, #tpu.memory_space<vmem>>, vector<1x12xf32>
    %72 = vector.broadcast %71 : vector<1x12xf32> to vector<64x12xf32>
    %73 = arith.addf %70, %72 : vector<64x12xf32>
    %c0_35 = arith.constant 0 : index
    %c0_36 = arith.constant 0 : index
    %74 = vector.load %arg8[%c0_35, %c0_36] : memref<64x12xf32, #tpu.memory_space<vmem>>, vector<64x12xf32>
    tpu.vector_store %arg8[%c0_35, %c0_36], %73 {strides = array<i32>} : memref<64x12xf32, #tpu.memory_space<vmem>>, vector<64x12xf32>,
    return
  }
  func.func @transform_0(%arg0: i32) -> (i32, i32) {
    %c0_i32 = arith.constant 0 : i32
    %c0_i32_0 = arith.constant 0 : i32
    return %arg0, %c0_i32 : i32, i32
  }
  func.func @transform_1(%arg0: i32) -> (i32, i32) {
    %c0_i32 = arith.constant 0 : i32
    %c0_i32_0 = arith.constant 0 : i32
    return %arg0, %c0_i32 : i32, i32
  }
  func.func @transform_2(%arg0: i32) -> (i32, i32, i32) {
    %c0_i32 = arith.constant 0 : i32
    %c0_i32_0 = arith.constant 0 : i32
    %c0_i32_1 = arith.constant 0 : i32
    %c0_i32_2 = arith.constant 0 : i32
    return %c0_i32, %c0_i32_0, %c0_i32_1 : i32, i32, i32
  }
  func.func @transform_3(%arg0: i32) -> (i32, i32) {
    %c0_i32 = arith.constant 0 : i32
    %c0_i32_0 = arith.constant 0 : i32
    %c0_i32_1 = arith.constant 0 : i32
    return %c0_i32, %c0_i32_0 : i32, i32
  }
  func.func @transform_4(%arg0: i32) -> (i32, i32) {
    %c0_i32 = arith.constant 0 : i32
    %c0_i32_0 = arith.constant 0 : i32
    %c0_i32_1 = arith.constant 0 : i32
    return %c0_i32, %c0_i32_0 : i32, i32
  }
  func.func @transform_5(%arg0: i32) -> (i32, i32) {
    %c0_i32 = arith.constant 0 : i32
    %c0_i32_0 = arith.constant 0 : i32
    %c0_i32_1 = arith.constant 0 : i32
    return %c0_i32, %c0_i32_0 : i32, i32
  }
  func.func @transform_6(%arg0: i32) -> (i32, i32) {
    %c0_i32 = arith.constant 0 : i32
    %c0_i32_0 = arith.constant 0 : i32
    %c0_i32_1 = arith.constant 0 : i32
    return %c0_i32, %c0_i32_0 : i32, i32
  }
  func.func @transform_7(%arg0: i32) -> (i32, i32) {
    %c0_i32 = arith.constant 0 : i32
    %c0_i32_0 = arith.constant 0 : i32
    return %arg0, %c0_i32 : i32, i32
  }
}

</mosaic_0001>

<bundles_post_ra>
// kernel: tpu_custom_call.1
= control target key start
LH: loop header
LB: loop body
LE: loop exit
PB: predicated region body
PF: predicated region fallthrough
CT: control target
= control target key end

     0   :  { %s1376_s24 = smov 0   ;;  %s1692_s0 = inlined_call_operand.vmem [shape: f32[128,4], index: 0, kind: input, shape index: {}]   ;;  %s1693_s1 = inlined_call_operand.vmem [shape: f32[128,4], index: 1, kind: input, shape index: {}]   ;;  %s1694_s2 = inlined_call_operand.vmem [shape: f32[3,4,8], index: 2, kind: input, shape index: {}]   ;;  %s1695_s3 = inlined_call_operand.vmem [shape: f32[1,8], index: 3, kind: input, shape index: {}]   ;;  %s1696_s4 = inlined_call_operand.vmem [shape: f32[4,12], index: 4, kind: input, shape index: {}]   ;;  %s1697_s5 = inlined_call_operand.vmem [shape: f32[1,12], index: 5, kind: input, shape index: {}]   ;;  %s1698_s6 = inlined_call_operand.vmem [shape: f32[4,12], index: 6, kind: input, shape index: {}]   ;;  %s1699_s7 = inlined_call_operand.vmem [shape: f32[128,12], index: 7, kind: output, shape index: {}]  }
   0x1 LB: > { %s1197_s25 = sadd.s32 4294967295, %s1333_s24   ;;  %p1201_p0 = scmp.ge.s32.totalorder %s1333_s24, 1  ;;  %s1333_s24 = sphi %s1376_s24, %s17_s24  }
   0x2   : > { %p249_p1 = scmp.lt.s32.totalorder %s1333_s24, 3 }
   0x4   : > { %p250_p2 = pnand %p1201_p0, %p249_p1 }
   0x5   : > { %s1202_s28 = sshll.u32 (!%p250_p2), %s1197_s25, 3  ;;  %s1335_s16 = smov (!%p250_p2), 124  }
   0x6   : > { %253 = sbr.rel (%p250_p2) target bundleno = 478 (0x1de), region = 48  ;;  %p287_p3 = scmp.lt.s32.totalorder (!%p250_p2), %s1202_s28, 15 }
   0xb   : > { %v1208_v0 = vld [vmem:[%s1694_s2 + $0x4] sm:$0xf]  ;;  %vm502_vm0 = vcmask 1043456   ;;  %v1227_v1 = vld [vmem:[%s1694_s2 + $0x8] sm:$0xf]  ;;  %v312_v3 = vlaneseq  ;;  %s1701_s28 = smov (!%p287_p3, %s1202_s28), 15 }
   0xc   : > { %1265 = vmatpush.msk.msra.mxu1 %vm502_vm0, %v1208_v0  ;;  %1266 = vmatpush.msk.msra.mxu2 %vm502_vm0, %v1208_v0  ;;  %v474_v2 = vld [vmem:[%s1694_s2] sm:$0xf]  ;;  %s1399_s10 = sshll.u32 %s1701_s28, 3  ;;  %vm477_vm1 = vcmask 31744  }
   0xd   : > { %1209 = vmatpush.msk.msra.mxu0 %vm502_vm0, %v1208_v0  ;;  %1267 = vmatpush.msk.msra.mxu3 %vm502_vm0, %v1208_v0  ;;  %s1405_s13 = scalar_lea.vmem %s1692_s0, %s1399_s10  ;;  %v1407_v4 = vshrl.u32 %v312_v3, 7  ;;  %s1550_s19 = scalar_lea.vmem %s1693_s1, %s1399_s10 }
   0xe   : > { %1228 = vmatpush.msk.msrb.mxu2 %vm502_vm0, %v1227_v1  ;;  %1218 = vmatpush.msk.msrb.mxu1 %vm502_vm0, %v474_v2  ;;  %v1410_v5 = vld [vmem:[%s1405_s13 + $0x10] sm:$0xff]  ;;  %v1413_v6 = vld [vmem:[%s1405_s13 + $0x20] sm:$0xff]  ;;  %v1426_v9 = vld [vmem:[%s1405_s13 + $0x38] sm:$0xff]  ;;  %s1671_s29 = scalar_lea.vmem %s1699_s7, %s1399_s10 }
   0xf   : > { %1212 = vmatmul.msk.f32.vlgmr.msra.gmra.mxu1 %vm477_vm1, %v1410_v5  ;;  %1214 = vmatmul.msk.f32.vlgmr.msra.gmra.mxu2 %vm477_vm1, %v1413_v6  ;;  %v1420_v7 = vld [vmem:[%s1405_s13] sm:$0xff]  ;;  %v325_v8 = vand.u32 15, %v1407_v4  ;;  %v1429_v10 = vld [vmem:[%s1405_s13 + $0x18] sm:$0xff]  ;;  %v1432_v11 = vld [vmem:[%s1405_s13 + $0x28] sm:$0xff]  ;;  %v424_v13 = vrot.slane %v1426_v9, 6  ;;  %v314_v16 = vadd.s32 8, %v1407_v4 }
  0x10   : > { %1210 = vmatmul.msk.f32.vlgmr.msra.gmra.mxu0 %vm477_vm1, %v1420_v7  ;;  %v417_v12 = vrot.slane %v1420_v7, 6  ;;  %v305_v15 = vld [vmem:[%s1405_s13 + $0x8] sm:$0xff]  ;;  %vm425_vm2 = vcmp.lt.s32.totalorder %v1407_v4, 2  ;;  %v615_v17 = vrot.slane %v1420_v7, 2  ;;  %vm623_vm4 = vcmp.lt.s32.totalorder %v1407_v4, 6  ;;  %v1461_v29 = vld [vmem:[%s1405_s13 + $0x30] sm:$0xff] }
  0x11   : > { %v434_v14 = vadd.s32 4294967294, %v325_v8  ;;  %v616_v18 = vrot.slane %v305_v15, 2  ;;  %v332_v20 = vand.u32 15, %v314_v16  ;;  %v617_v23 = vrot.slane %v1410_v5, 2  ;;  %1216 = vmatmul.msk.f32.vlgmr.msra.gmra.mxu3 %vm477_vm1, %v1461_v29 }
  0x12   : > { %v433_v19 = vsel %vm425_vm2, %v424_v13, %v417_v12  ;;  %v315_v25 = vadd.s32 16, %v1407_v4  ;;  %v418_v26 = vrot.slane %v305_v15, 6  ;;  %v419_v32 = vrot.slane %v1410_v5, 6 }
  0x13   : > { %vm442_vm3 = vcmp.ge.s32.totalorder %v434_v14, 0  ;;  %v630_v22 = vsel %vm623_vm4, %v615_v17, %v616_v18  ;;  %v633_v24 = vadd.s32 2, %v332_v20  ;;  %v629_v27 = vsel %vm623_vm4, %v616_v18, %v617_v23 }
  0x14   : > { %v466_v21 = vsel %vm442_vm3, %v433_v19, 0.0  ;;  %v339_v28 = vand.u32 15, %v315_v25  ;;  %v432_v30 = vsel %vm425_vm2, %v417_v12, %v418_v26  ;;  %v316_v34 = vadd.s32 24, %v1407_v4 }
  0x15   : > { %vm649_vm5 = vcmp.lt.s32.totalorder %v633_v24, 16  ;;  %v618_v35 = vrot.slane %v1429_v10, 2  ;;  %v431_v36 = vsel %vm425_vm2, %v418_v26, %v419_v32  ;;  %v619_v40 = vrot.slane %v1413_v6, 2 }
  0x16   : > { %v665_v31 = vsel %vm649_vm5, %v629_v27, 0.0  ;;  %v436_v33 = vadd.s32 4294967294, %v339_v28  ;;  %v346_v37 = vand.u32 15, %v316_v34  ;;  %v317_v42 = vadd.s32 32, %v1407_v4 }
  0x17   : > { %1213 = vmatmul.msk.f32.gmra.mxu1 %vm477_vm1, %v1429_v10  ;;  %1215 = vmatmul.msk.f32.gmra.mxu2 %vm477_vm1, %v1432_v11  ;;  %v628_v39 = vsel %vm623_vm4, %v617_v23, %v618_v35  ;;  %v420_v43 = vrot.slane %v1429_v10, 6  ;;  %v627_v44 = vsel %vm623_vm4, %v618_v35, %v619_v40  ;;  %v421_v48 = vrot.slane %v1413_v6, 6 }
  0x18   : > { %1211 = vmatmul.msk.f32.gmra.mxu0 %vm477_vm1, %v305_v15  ;;  %vm444_vm6 = vcmp.ge.s32.totalorder %v436_v33, 0  ;;  %v635_v41 = vadd.s32 2, %v346_v37  ;;  %v353_v45 = vand.u32 15, %v317_v42  ;;  %v318_v50 = vadd.s32 40, %v1407_v4 }
  0x19   : > { %1217 = vmatmul.msk.f32.gmra.mxu3 %vm477_vm1, %v1426_v9  ;;  %v468_v38 = vsel %vm444_vm6, %v431_v36, 0.0  ;;  %v430_v46 = vsel %vm425_vm2, %v419_v32, %v420_v43  ;;  %v620_v51 = vrot.slane %v1432_v11, 2  ;;  %v429_v52 = vsel %vm425_vm2, %v420_v43, %v421_v48 }
  0x1a   : > { %vm651_vm7 = vcmp.lt.s32.totalorder %v635_v41, 16  ;;  %v438_v49 = vadd.s32 4294967294, %v353_v45  ;;  %v360_v53 = vand.u32 15, %v318_v50  ;;  %v621_v56 = vrot.slane %v1461_v29, 2 }
  0x1b   : > { %v667_v47 = vsel %vm651_vm7, %v627_v44, 0.0  ;;  %v626_v55 = vsel %vm623_vm4, %v619_v40, %v620_v51  ;;  %v319_v58 = vadd.s32 48, %v1407_v4  ;;  %v422_v59 = vrot.slane %v1432_v11, 6 }
  0x1c   : > { %vm446_vm8 = vcmp.ge.s32.totalorder %v438_v49, 0  ;;  %v637_v57 = vadd.s32 2, %v360_v53  ;;  %v625_v60 = vsel %vm623_vm4, %v620_v51, %v621_v56  ;;  %v423_v0 = vrot.slane %v1461_v29, 6  ;;  %v962_v53 = vld [vmem:[%s1696_s4] sm:$0xf] }
  0x1d   : > { %v470_v54 = vsel %vm446_vm8, %v429_v52, 0.0  ;;  %v367_v61 = vand.u32 15, %v319_v58  ;;  %v428_v62 = vsel %vm425_vm2, %v421_v48, %v422_v59  ;;  %v320_v2 = vadd.s32 56, %v1407_v4  ;;  %v971_v52 = vld [vmem:[%s1698_s6] sm:$0xf]  ;;  %1254 = vmatpush.msk.msrb.mxu0 %vm502_vm0, %v962_v53 }
  0x1e   : > { %vm653_vm9 = vcmp.lt.s32.totalorder %v637_v57, 16  ;;  %v622_v3 = vrot.slane %v1426_v9, 2  ;;  %v427_v5 = vsel %vm425_vm2, %v422_v59, %v423_v0  ;;  %v426_v15 = vsel %vm425_vm2, %v423_v0, %v424_v13  ;;  %1245 = vmatpush.msk.msrb.mxu3 %vm502_vm0, %v971_v52  ;;  %v968_v52 = vld [vmem:[%s1550_s19 + $0x28] sm:$0xff] }
  0x1f   : > { %1219 = vmatmul.msk.f32.vlgmr.msrb.gmra.mxu1 %vm477_vm1, %v466_v21  ;;  %1229 = vmatmul.msk.f32.vlgmr.msrb.gmra.mxu2 %vm477_vm1, %v630_v22  ;;  %v669_v63 = vsel %vm653_vm9, %v625_v60, 0.0  ;;  %v440_v1 = vadd.s32 4294967294, %v367_v61  ;;  %v374_v6 = vand.u32 15, %v320_v2 }
  0x20   : > { %v624_v8 = vsel %vm623_vm4, %v621_v56, %v622_v3  ;;  %v631_v12 = vsel %vm623_vm4, %v622_v3, %v615_v17  ;;  %v1529_v17 = vld [vmem:[%s1695_s3] ss:$0 sm:$0xff] }
  0x21   : > { %vm448_vm10 = vcmp.ge.s32.totalorder %v440_v1, 0  ;;  %v639_v11 = vadd.s32 2, %v374_v6 }
  0x22   : > { %v472_v10 = vsel %vm448_vm10, %v427_v5, 0.0 }
  0x23   : > { %vm655_vm11 = vcmp.lt.s32.totalorder %v639_v11, 16 }
  0x24   : > { %v671_v14 = vsel %vm655_vm11, %v631_v12, 0.0 }
  0x27   : > { %1220 = vmatmul.msk.f32.gmra.mxu1 %vm477_vm1, %v432_v30  ;;  %1230 = vmatmul.msk.f32.gmra.mxu2 %vm477_vm1, %v665_v31 }
  0x2f   : > { %1221 = vmatmul.msk.f32.gmra.mxu1 %vm477_vm1, %v468_v38  ;;  %1231 = vmatmul.msk.f32.gmra.mxu2 %vm477_vm1, %v628_v39 }
  0x37   : > { %1222 = vmatmul.msk.f32.gmra.mxu1 %vm477_vm1, %v430_v46  ;;  %1232 = vmatmul.msk.f32.gmra.mxu2 %vm477_vm1, %v667_v47 }
  0x3f   : > { %1223 = vmatmul.msk.f32.gmra.mxu1 %vm477_vm1, %v470_v54  ;;  %1233 = vmatmul.msk.f32.gmra.mxu2 %vm477_vm1, %v626_v55  ;;  %v963_v54 = vld [vmem:[%s1550_s19] sm:$0xff] }
  0x40   : > { %1246 = vmatmul.msk.f32.vlgmr.msrb.gmra.mxu3 %vm477_vm1, %v963_v54 }
  0x47   : > { %1224 = vmatmul.msk.f32.gmra.mxu1 %vm477_vm1, %v428_v62  ;;  %1234 = vmatmul.msk.f32.gmra.mxu2 %vm477_vm1, %v669_v63 }
  0x4f   : > { %1235 = vmatmul.msk.f32.gmra.mxu2 %vm477_vm1, %v624_v8  ;;  %1225 = vmatmul.msk.f32.gmra.mxu1 %vm477_vm1, %v472_v10 }
  0x57   : > { %1236 = vmatmul.msk.f32.gmra.mxu2 %vm477_vm1, %v671_v14  ;;  %1226 = vmatmul.msk.f32.gmra.mxu1 %vm477_vm1, %v426_v15 }
  0x8c   : > { %v529_v16 = vpop.f32.mrf.mxu1 }
  0x8d   : > { %v523_v21 = vpop.f32.mrf.mxu0 }
  0x92   : > { %v535_v18 = vpop.f32.mrf.mxu2 }
  0x94   : > { %v532_v19 = vpop.f32.mrf.mxu1  ;;  %v541_v51 = vpop.f32.mrf.mxu3 }
  0x95   : > { %v526_v13 = vpop.f32.mrf.mxu0 }
  0x9a   : > { %v538_v20 = vpop.f32.mrf.mxu2 }
  0x9c   : > { %v591_v7 = vpop.f32.mrf.mxu1  ;;  %v544_v62 = vpop.f32.mrf.mxu3 }
  0x9d   : > { %v592_v22 = vadd.f32 %v591_v7, %v523_v21 }
  0xa2   : > { %v718_v9 = vpop.f32.mrf.mxu2 }
  0xa3   : > { %v742_v23 = vadd.f32 %v718_v9, %v592_v22  ;;  %v965_v22 = vld [vmem:[%s1550_s19 + $0x10] sm:$0xff] }
  0xa4   : > { %v594_v4 = vpop.f32.mrf.mxu1 }
  0xa5   : > { %v1532_v24 = vadd.f32 %v1529_v17, %v742_v23  ;;  %v595_v25 = vadd.f32 %v594_v4, %v526_v13 }
  0xa7   : > { %1279 = vtanh.f32 %v1532_v24  ;;  %v1237_v11 = vmul.f32 -1.442695, %v1532_v24 }
  0xaa   : > { %v721_v26 = vpop.f32.mrf.mxu2 }
  0xab   : > { %v743_v27 = vadd.f32 %v721_v26, %v595_v25  ;;  %v966_v25 = vld [vmem:[%s1550_s19 + $0x18] sm:$0xff] }
  0xac   : > { %v597_v28 = vpop.f32.mrf.mxu1 }
  0xad   : > { %v1280_v29 = vpop.eup %1279  ;;  %v1536_v30 = vadd.f32 %v1529_v17, %v743_v27  ;;  %v598_v31 = vadd.f32 %v597_v28, %v529_v16 }
  0xae   : > { %930 = vrot.lane.b32.xlu0 %v1280_v29, %s1335_s16 }
  0xaf   : > { %1281 = vtanh.f32 %v1536_v30  ;;  %v1238_v12 = vmul.f32 -1.442695, %v1536_v30 }
  0xb2   : > { %v724_v32 = vpop.f32.mrf.mxu2 }
  0xb3   : > { %v744_v33 = vadd.f32 %v724_v32, %v598_v31 }
  0xb4   : > { %v600_v34 = vpop.f32.mrf.mxu1 }
  0xb5   : > { %v1282_v35 = vpop.eup %1281  ;;  %v756_v36 = vadd.f32 %v1529_v17, %v744_v33  ;;  %v601_v37 = vadd.f32 %v600_v34, %v532_v19 }
  0xb6   : > { %932 = vrot.lane.b32.xlu0 %v1282_v35, %s1335_s16 }
  0xb7   : > { %1283 = vtanh.f32 %v756_v36  ;;  %v1239_v16 = vmul.f32 -1.442695, %v756_v36  ;;  %v967_v36 = vld [vmem:[%s1550_s19 + $0x20] sm:$0xff] }
  0xba   : > { %v727_v38 = vpop.f32.mrf.mxu2 }
  0xbb   : > { %v745_v39 = vadd.f32 %v727_v38, %v601_v37 }
  0xbc   : > { %v603_v40 = vpop.f32.mrf.mxu1 }
  0xbd   : > { %v1284_v41 = vpop.eup %1283  ;;  %v757_v42 = vadd.f32 %v1529_v17, %v745_v39  ;;  %v604_v43 = vadd.f32 %v603_v40, %v535_v18  ;;  %v964_v18 = vld [vmem:[%s1550_s19 + $0x8] sm:$0xff] }
  0xbe   : > { %934 = vrot.lane.b32.xlu1 %v1284_v41, %s1335_s16  ;;  %1247 = vmatmul.msk.f32.gmra.mxu3 %vm477_vm1, %v964_v18 }
  0xbf   : > { %1285 = vtanh.f32 %v757_v42  ;;  %v1240_v7 = vmul.f32 -1.442695, %v757_v42 }
  0xc2   : > { %v730_v44 = vpop.f32.mrf.mxu2 }
  0xc3   : > { %v746_v45 = vadd.f32 %v730_v44, %v604_v43 }
  0xc4   : > { %v606_v46 = vpop.f32.mrf.mxu1 }
  0xc5   : > { %v1286_v47 = vpop.eup %1285  ;;  %v758_v48 = vadd.f32 %v1529_v17, %v746_v45  ;;  %v607_v49 = vadd.f32 %v606_v46, %v538_v20 }
  0xc6   : > { %936 = vrot.lane.b32.xlu1 %v1286_v47, %s1335_s16  ;;  %1248 = vmatmul.msk.f32.gmra.mxu3 %vm477_vm1, %v965_v22 }
  0xc7   : > { %1287 = vtanh.f32 %v758_v48  ;;  %v1241_v24 = vmul.f32 -1.442695, %v758_v48 }
  0xca   : > { %v733_v50 = vpop.f32.mrf.mxu2 }
  0xcb   : > { %v747_v55 = vadd.f32 %v733_v50, %v607_v49 }
  0xcc   : > { %v609_v56 = vpop.f32.mrf.mxu1 }
  0xcd   : > { %v1288_v57 = vpop.eup %1287  ;;  %v759_v58 = vadd.f32 %v1529_v17, %v747_v55  ;;  %v610_v59 = vadd.f32 %v609_v56, %v541_v51 }
  0xce   : > { %938 = vrot.lane.b32.xlu2 %v1288_v57, %s1335_s16  ;;  %1249 = vmatmul.msk.f32.gmra.mxu3 %vm477_vm1, %v966_v25 }
  0xcf   : > { %1289 = vtanh.f32 %v759_v58  ;;  %v1242_v34 = vmul.f32 -1.442695, %v759_v58 }
  0xd2   : > { %v736_v60 = vpop.f32.mrf.mxu2 }
  0xd3   : > { %v748_v61 = vadd.f32 %v736_v60, %v610_v59 }
  0xd4   : > { %v612_v63 = vpop.f32.mrf.mxu1 }
  0xd5   : > { %v1290_v0 = vpop.eup %1289  ;;  %v1565_v1 = vadd.f32 %v1529_v17, %v748_v61  ;;  %v613_v2 = vadd.f32 %v612_v63, %v544_v62 }
  0xd6   : > { %940 = vrot.lane.b32.xlu2 %v1290_v0, %s1335_s16  ;;  %1250 = vmatmul.msk.f32.gmra.mxu3 %vm477_vm1, %v967_v36 }
  0xd7   : > { %1291 = vtanh.f32 %v1565_v1  ;;  %v1243_v50 = vmul.f32 -1.442695, %v1565_v1 }
  0xda   : > { %v739_v3 = vpop.f32.mrf.mxu2 }
  0xdb   : > { %v749_v5 = vadd.f32 %v739_v3, %v613_v2 }
  0xdd   : > { %v1292_v6 = vpop.eup %1291  ;;  %v1570_v8 = vadd.f32 %v1529_v17, %v749_v5  ;;  %v969_v5 = vld [vmem:[%s1550_s19 + $0x30] sm:$0xff] }
  0xde   : > { %942 = vrot.lane.b32.xlu0 %v1292_v6, %s1335_s16  ;;  %1251 = vmatmul.msk.f32.gmra.mxu3 %vm477_vm1, %v968_v52 }
  0xdf   : > { %1293 = vtanh.f32 %v1570_v8  ;;  %v1244_v2 = vmul.f32 -1.442695, %v1570_v8 }
  0xe0   : > { %1295 = vpow2.f32 %v1237_v11 }
  0xe1   : > { %1297 = vpow2.f32 %v1238_v12 }
  0xe5   : > { %v1294_v10 = vpop.eup %1293 }
  0xe6   : > { %944 = vrot.lane.b32.xlu1 %v1294_v10, %s1335_s16  ;;  %v1296_v14 = vpop.eup %1295  ;;  %1252 = vmatmul.msk.f32.gmra.mxu3 %vm477_vm1, %v969_v5 }
  0xe7   : > { %v786_v15 = vadd.f32 1.0, %v1296_v14  ;;  %v1298_v19 = vpop.eup %1297 }
  0xe8   : > { %v1579_v20 = vadd.f32 1.0, %v1298_v19 }
  0xe9   : > { %1299 = vrcp.f32 %v786_v15  ;;  %v805_v33 = vand.u32 2147483648, %v786_v15  ;;  %vm799_vm13 = vweird.f32 %v786_v15  ;;  %v803_v35 = vand.u32 2147483647, %v786_v15 }
  0xea   : > { %1301 = vpow2.f32 %v1239_v16  ;;  %v820_v49 = vand.u32 2147483648, %v1579_v20  ;;  %vm814_vm2 = vweird.f32 %v1579_v20  ;;  %v818_v51 = vand.u32 2147483647, %v1579_v20 }
  0xeb   : > { %1303 = vrcp.f32 %v1579_v20  ;;  %v806_v41 = vor.u32 1.1754944e-38, %v805_v33  ;;  %vm804_vm15 = vcmp.eq.f32.partialorder %v803_v35, 8.507059e+37 }
  0xec   : > { %1305 = vpow2.f32 %v1240_v7  ;;  %v821_v57 = vor.u32 1.1754944e-38, %v820_v49  ;;  %vm819_vm4 = vcmp.eq.f32.partialorder %v818_v51, 8.507059e+37 }
  0xef   : > { %v1300_v21 = vpop.eup %1299 }
  0xf0   : > { %v1302_v17 = vpop.eup %1301  ;;  %v795_v9 = vmul.f32 %v1300_v21, %v786_v15  ;;  %vm800_vm12 = vweird.f32 %v1300_v21 }
  0xf1   : > { %v1584_v23 = vadd.f32 1.0, %v1302_v17  ;;  %v1304_v13 = vpop.eup %1303  ;;  %vm801_vm14 = vmor %vm799_vm13, %vm800_vm12  ;;  %v970_v17 = vld [vmem:[%s1550_s19 + $0x38] sm:$0xff] }
  0xf2   : > { %v796_v4 = vsub.f32 1.0, %v795_v9  ;;  %v1306_v26 = vpop.eup %1305  ;;  %v810_v28 = vmul.f32 %v1304_v13, %v1579_v20  ;;  %vm815_vm0 = vweird.f32 %v1304_v13  ;;  %1253 = vmatmul.msk.f32.gmra.mxu3 %vm477_vm1, %v970_v17 }
  0xf3   : > { %1307 = vrcp.f32 %v1584_v23  ;;  %v1590_v29 = vadd.f32 1.0, %v1306_v26  ;;  %vm816_vm3 = vmor %vm814_vm2, %vm815_vm0  ;;  %v835_v1 = vand.u32 2147483648, %v1584_v23  ;;  %vm829_vm6 = vweird.f32 %v1584_v23 }
  0xf4   : > { %v797_v27 = vmul.f32 %v1300_v21, %v796_v4  ;;  %1309 = vpow2.f32 %v1241_v24  ;;  %v811_v31 = vsub.f32 1.0, %v810_v28  ;;  %v833_v3 = vand.u32 2147483647, %v1584_v23 }
  0xf5   : > { %1311 = vrcp.f32 %v1590_v29  ;;  %v836_v8 = vor.u32 1.1754944e-38, %v835_v1  ;;  %v850_v7 = vand.u32 2147483648, %v1590_v29  ;;  %vm844_vm10 = vweird.f32 %v1590_v29 }
  0xf6   : > { %v798_v30 = vadd.f32 %v1300_v21, %v797_v27  ;;  %v812_v39 = vmul.f32 %v1304_v13, %v811_v31  ;;  %1313 = vpow2.f32 %v1242_v34  ;;  %vm834_vm8 = vcmp.eq.f32.partialorder %v833_v3, 8.507059e+37 }
  0xf7   : > { %v848_v22 = vand.u32 2147483647, %v1590_v29  ;;  %v851_v24 = vor.u32 1.1754944e-38, %v850_v7 }
  0xf8   : > { %v802_v38 = vsel %vm801_vm14, %v1300_v21, %v798_v30  ;;  %v813_v46 = vadd.f32 %v1304_v13, %v812_v39 }
  0xf9   : > { %v1592_v32 = vpop.eup %1307  ;;  %v807_v44 = vsel %vm804_vm15, %v806_v41, %v802_v38  ;;  %vm849_vm12 = vcmp.eq.f32.partialorder %v848_v22, 8.507059e+37 }
  0xfa   : > { %v1310_v37 = vpop.eup %1309  ;;  %v825_v40 = vmul.f32 %v1592_v32, %v1584_v23  ;;  %v817_v54 = vsel %vm816_vm3, %v1304_v13, %v813_v46  ;;  %vm830_vm5 = vweird.f32 %v1592_v32 }
  0xfb   : > { %v1599_v42 = vadd.f32 1.0, %v1310_v37  ;;  %v1601_v48 = vpop.eup %1311  ;;  %v822_v60 = vsel %vm819_vm4, %v821_v57, %v817_v54  ;;  %vm831_vm7 = vmor %vm829_vm6, %vm830_vm5 }
  0xfc   : > { %v826_v47 = vsub.f32 1.0, %v825_v40  ;;  %v1314_v53 = vpop.eup %1313  ;;  %v840_v56 = vmul.f32 %v1601_v48, %v1590_v29  ;;  %vm845_vm9 = vweird.f32 %v1601_v48 }
  0xfd   : > { %1315 = vrcp.f32 %v1599_v42  ;;  %v1614_v58 = vadd.f32 1.0, %v1314_v53  ;;  %vm846_vm11 = vmor %vm844_vm10, %vm845_vm9  ;;  %vm859_vm14 = vweird.f32 %v1599_v42  ;;  %v863_v33 = vand.u32 2147483647, %v1599_v42 }
  0xfe   : > { %v827_v55 = vmul.f32 %v1592_v32, %v826_v47  ;;  %1317 = vpow2.f32 %v1243_v50  ;;  %v841_v63 = vsub.f32 1.0, %v840_v56 }
  0xff   : > { %1319 = vrcp.f32 %v1614_v58  ;;  %vm864_vm0 = vcmp.eq.f32.partialorder %v863_v33, 8.507059e+37  ;;  %vm874_vm3 = vweird.f32 %v1614_v58 }
 0x100   : > { %v828_v62 = vadd.f32 %v1592_v32, %v827_v55  ;;  %v842_v12 = vmul.f32 %v1601_v48, %v841_v63  ;;  %1321 = vpow2.f32 %v1244_v2 }
 0x102   : > { %v832_v11 = vsel %vm831_vm7, %v1592_v32, %v828_v62  ;;  %v843_v20 = vadd.f32 %v1601_v48, %v842_v12  ;;  %v865_v32 = vand.u32 2147483648, %v1599_v42 }
 0x103   : > { %v1316_v0 = vpop.eup %1315  ;;  %v837_v16 = vsel %vm834_vm8, %v836_v8, %v832_v11  ;;  %v1016_v11 = vpop.f32.mrf.mxu3  ;;  %v1278_v8 = vld [vmem:[%s1697_s5] ss:$0 sm:$0xff] }
 0x104   : > { %v1318_v6 = vpop.eup %1317  ;;  %v855_v10 = vmul.f32 %v1316_v0, %v1599_v42  ;;  %v847_v13 = vsel %vm846_vm11, %v1601_v48, %v843_v20  ;;  %vm860_vm13 = vweird.f32 %v1316_v0  ;;  %v866_v38 = vor.u32 1.1754944e-38, %v865_v32 }
 0x105   : > { %v1629_v14 = vadd.f32 1.0, %v1318_v6  ;;  %v1320_v21 = vpop.eup %1319  ;;  %v852_v26 = vsel %vm849_vm12, %v851_v24, %v847_v13  ;;  %vm861_vm15 = vmor %vm859_vm14, %vm860_vm13  ;;  %v880_v42 = vand.u32 2147483648, %v1614_v58  ;;  %vm1120_vm14 = vcmask 97280  }
 0x106   : > { %v856_v18 = vsub.f32 1.0, %v855_v10  ;;  %v1322_v9 = vpop.eup %1321  ;;  %v870_v4 = vmul.f32 %v1320_v21, %v1614_v58  ;;  %vm875_vm2 = vweird.f32 %v1320_v21 }
 0x107   : > { %1323 = vrcp.f32 %v1629_v14  ;;  %v1642_v25 = vadd.f32 1.0, %v1322_v9  ;;  %vm876_vm4 = vmor %vm874_vm3, %vm875_vm2  ;;  %v881_v49 = vor.u32 1.1754944e-38, %v880_v42  ;;  %v895_v55 = vand.u32 2147483648, %v1629_v14 }
 0x108   : > { %v857_v23 = vmul.f32 %v1316_v0, %v856_v18  ;;  %v871_v29 = vsub.f32 1.0, %v870_v4  ;;  %vm889_vm7 = vweird.f32 %v1629_v14  ;;  %v893_v56 = vand.u32 2147483647, %v1629_v14 }
 0x109   : > { %1325 = vrcp.f32 %v1642_v25  ;;  %vm904_vm11 = vweird.f32 %v1642_v25  ;;  %v908_v1 = vand.u32 2147483647, %v1642_v25 }
 0x10a   : > { %v858_v28 = vadd.f32 %v1316_v0, %v857_v23  ;;  %v872_v36 = vmul.f32 %v1320_v21, %v871_v29  ;;  %vm894_vm9 = vcmp.eq.f32.partialorder %v893_v56, 8.507059e+37 }
 0x10b   : > { %vm909_vm13 = vcmp.eq.f32.partialorder %v908_v1, 8.507059e+37 }
 0x10c   : > { %v862_v35 = vsel %vm861_vm15, %v1316_v0, %v858_v28  ;;  %v873_v41 = vadd.f32 %v1320_v21, %v872_v36  ;;  %v910_v0 = vand.u32 2147483648, %v1642_v25 }
 0x10d   : > { %v1324_v31 = vpop.eup %1323  ;;  %v867_v39 = vsel %vm864_vm0, %v866_v38, %v862_v35 }
 0x10e   : > { %v885_v37 = vmul.f32 %v1324_v31, %v1629_v14  ;;  %v877_v46 = vsel %vm876_vm4, %v1320_v21, %v873_v41  ;;  %vm890_vm6 = vweird.f32 %v1324_v31  ;;  %v911_v3 = vor.u32 1.1754944e-38, %v910_v0 }
 0x10f   : > { %vm891_vm8 = vmor %vm889_vm7, %vm890_vm6 }
 0x120   : > { %v931_v43 = vpop.permute.xlu0 %930 }
 0x121   : > { %v954_v45 = vmul.f32 %v931_v43, %v807_v44  ;;  %v886_v43 = vsub.f32 1.0, %v885_v37  ;;  %v1326_v44 = vpop.eup %1325 }
 0x122   : > { %v900_v48 = vmul.f32 %v1326_v44, %v1642_v25  ;;  %vm905_vm10 = vweird.f32 %v1326_v44 }
 0x123   : > { %1255 = vmatmul.msk.f32.vlgmr.msrb.gmra.mxu0 %vm477_vm1, %v954_v45  ;;  %v878_v45 = vand.u32 2147483647, %v1614_v58  ;;  %v887_v47 = vmul.f32 %v1324_v31, %v886_v43  ;;  %vm906_vm12 = vmor %vm904_vm11, %vm905_vm10 }
 0x124   : > { %v901_v54 = vsub.f32 1.0, %v900_v48 }
 0x125   : > { %vm879_vm5 = vcmp.eq.f32.partialorder %v878_v45, 8.507059e+37  ;;  %v888_v53 = vadd.f32 %v1324_v31, %v887_v47 }
 0x126   : > { %v882_v51 = vsel %vm879_vm5, %v881_v49, %v877_v46  ;;  %v902_v58 = vmul.f32 %v1326_v44, %v901_v54 }
 0x127   : > { %v892_v57 = vsel %vm891_vm8, %v1324_v31, %v888_v53 }
 0x128   : > { %v933_v59 = vpop.permute.xlu0 %932  ;;  %v939_v34 = vpop.permute.xlu2 %938  ;;  %v903_v63 = vadd.f32 %v1326_v44, %v902_v58 }
 0x129   : > { %v955_v61 = vmul.f32 %v933_v59, %v822_v60  ;;  %v958_v40 = vmul.f32 %v939_v34, %v867_v39  ;;  %v896_v59 = vor.u32 1.1754944e-38, %v895_v55 }
 0x12a   : > { %v907_v2 = vsel %vm906_vm12, %v1326_v44, %v903_v63 }
 0x12b   : > { %1256 = vmatmul.msk.f32.gmra.mxu0 %vm477_vm1, %v955_v61  ;;  %v897_v60 = vsel %vm894_vm9, %v896_v59, %v892_v57  ;;  %v912_v5 = vsel %vm909_vm13, %v911_v3, %v907_v2 }
 0x130   : > { %v935_v15 = vpop.permute.xlu1 %934  ;;  %v941_v50 = vpop.permute.xlu2 %940 }
 0x131   : > { %v956_v19 = vmul.f32 %v935_v15, %v837_v16  ;;  %v959_v52 = vmul.f32 %v941_v50, %v882_v51 }
 0x133   : > { %1257 = vmatmul.msk.f32.gmra.mxu0 %vm477_vm1, %v956_v19 }
 0x138   : > { %v937_v27 = vpop.permute.xlu1 %936 }
 0x139   : > { %v957_v30 = vmul.f32 %v937_v27, %v852_v26 }
 0x13b   : > { %1258 = vmatmul.msk.f32.gmra.mxu0 %vm477_vm1, %v957_v30 }
 0x141   : > { %v1019_v12 = vpop.f32.mrf.mxu3 }
 0x143   : > { %1259 = vmatmul.msk.f32.gmra.mxu0 %vm477_vm1, %v958_v40 }
 0x149   : > { %v1022_v18 = vpop.f32.mrf.mxu3 }
 0x14b   : > { %1260 = vmatmul.msk.f32.gmra.mxu0 %vm477_vm1, %v959_v52 }
 0x150   : > { %v943_v61 = vpop.permute.xlu0 %942 }
 0x151   : > { %v960_v62 = vmul.f32 %v943_v61, %v897_v60  ;;  %v1025_v7 = vpop.f32.mrf.mxu3 }
 0x153   : > { %1261 = vmatmul.msk.f32.gmra.mxu0 %vm477_vm1, %v960_v62 }
 0x158   : > { %v945_v6 = vpop.permute.xlu1 %944 }
 0x159   : > { %v961_v10 = vmul.f32 %v945_v6, %v912_v5  ;;  %v1028_v4 = vpop.f32.mrf.mxu3 }
 0x15b   : > { %1262 = vmatmul.msk.f32.gmra.mxu0 %vm477_vm1, %v961_v10 }
 0x161   : > { %v1031_v27 = vpop.f32.mrf.mxu3 }
 0x169   : > { %v1034_v32 = vpop.f32.mrf.mxu3 }
 0x175   : > { %v1037_v36 = vpop.f32.mrf.mxu3 }
 0x1a0   : > { %v1084_v14 = vpop.f32.mrf.mxu0 }
 0x1a1   : > { %v1085_v15 = vadd.f32 %v1084_v14, %v1016_v11 }
 0x1a3   : > { %v1112_v16 = vadd.f32 %v1278_v8, %v1085_v15 }
 0x1a5   : > { %1121 = vst.msk [vmem:[%s1671_s29] sm:$0xff] %vm1120_vm14, %v1112_v16 }
 0x1a8   : > { %v1087_v19 = vpop.f32.mrf.mxu0 }
 0x1a9   : > { %v1088_v20 = vadd.f32 %v1087_v19, %v1019_v12 }
 0x1ab   : > { %v1113_v21 = vadd.f32 %v1278_v8, %v1088_v20 }
 0x1ad   : > { %1122 = vst.msk [vmem:[%s1671_s29 + $0x8] sm:$0xff] %vm1120_vm14, %v1113_v21 }
 0x1b0   : > { %v1090_v22 = vpop.f32.mrf.mxu0 }
 0x1b1   : > { %v1091_v17 = vadd.f32 %v1090_v22, %v1022_v18 }
 0x1b3   : > { %v1114_v9 = vadd.f32 %v1278_v8, %v1091_v17 }
 0x1b5   : > { %1123 = vst.msk [vmem:[%s1671_s29 + $0x10] sm:$0xff] %vm1120_vm14, %v1114_v9 }
 0x1b8   : > { %v1093_v23 = vpop.f32.mrf.mxu0 }
 0x1b9   : > { %v1094_v13 = vadd.f32 %v1093_v23, %v1025_v7 }
 0x1bb   : > { %v1115_v24 = vadd.f32 %v1278_v8, %v1094_v13 }
 0x1bd   : > { %1124 = vst.msk [vmem:[%s1671_s29 + $0x18] sm:$0xff] %vm1120_vm14, %v1115_v24 }
 0x1c0   : > { %v1096_v25 = vpop.f32.mrf.mxu0 }
 0x1c1   : > { %v1097_v26 = vadd.f32 %v1096_v25, %v1028_v4 }
 0x1c3   : > { %v1116_v28 = vadd.f32 %v1278_v8, %v1097_v26 }
 0x1c5   : > { %1125 = vst.msk [vmem:[%s1671_s29 + $0x20] sm:$0xff] %vm1120_vm14, %v1116_v28 }
 0x1c8   : > { %v1099_v29 = vpop.f32.mrf.mxu0 }
 0x1c9   : > { %v1100_v30 = vadd.f32 %v1099_v29, %v1031_v27 }
 0x1cb   : > { %v1117_v31 = vadd.f32 %v1278_v8, %v1100_v30 }
 0x1cd   : > { %1126 = vst.msk [vmem:[%s1671_s29 + $0x28] sm:$0xff] %vm1120_vm14, %v1117_v31 }
 0x1d0   : > { %v1102_v33 = vpop.f32.mrf.mxu0 }
 0x1d1   : > { %v1103_v34 = vadd.f32 %v1102_v33, %v1034_v32 }
 0x1d3   : > { %v1118_v35 = vadd.f32 %v1278_v8, %v1103_v34 }
 0x1d5   : > { %1127 = vst.msk [vmem:[%s1671_s29 + $0x30] sm:$0xff] %vm1120_vm14, %v1118_v35 }
 0x1d8   : > { %v1105_v37 = vpop.f32.mrf.mxu0 }
 0x1d9   : > { %v1106_v38 = vadd.f32 %v1105_v37, %v1037_v36 }
 0x1db   : > { %v1119_v39 = vadd.f32 %v1278_v8, %v1106_v38 }
 0x1dd   : > { %1128 = vst.msk [vmem:[%s1671_s29 + $0x38] sm:$0xff] %vm1120_vm14, %v1119_v39 }
 0x1de PF: > { %s17_s24 = sadd.s32 1, %s1333_s24  }
 0x1df   : > { %p14_p4 = scmp.ge.s32.totalorder %s17_s24, 4  }
 0x1e1   :  { %16 = sbr.rel (!%p14_p4) target bundleno = 1 (0x1), region = 83 }

</bundles_post_ra>
